<compile_context>
chip_gen: v7x
topology: tpu7x:2x2x1
jax: 0.10.0
libtpu: 0.0.40
codegen_flags: <defaults>
</compile_context>

<pallas_src>
import jax
import jax.numpy as jnp
from jax.experimental import pallas as pl
from jax.experimental.pallas import tpu as pltpu

LANE = 128          # vreg lane width
SUBLANE_BF16 = 16   # bf16 packs 16 sublanes per vreg -> batch-tile granularity


def _round_up(x, m):
    return (x + m - 1) // m * m


# ----------------------------------------------------------------------------
# Kernel
# ----------------------------------------------------------------------------
def ffn_kernel(x_ref, w1_ref, b1_ref, w2_ref, b2_ref, o_ref):
    # x_ref : (TB, H)    f32   (cast to bf16 in-register for the MXU)
    # w1_ref: (H, FHp)   bf16   b1_ref: (1, FHp) f32
    # w2_ref: (FHp, Op)  bf16   b2_ref: (1, Op)  f32
    # o_ref : (TB, Op)   f32   (lane-dense: Op is a multiple of 128)
    x = x_ref[...].astype(jnp.bfloat16)
    # Dropout(p_in) -> identity (eval mode)
    h = jnp.dot(x, w1_ref[...], preferred_element_type=jnp.float32) + b1_ref[...]
    h = jnp.maximum(h, 0.0)                                    # ReLU
    # Dropout(p) -> identity (eval mode)
    y = jnp.dot(h.astype(jnp.bfloat16), w2_ref[...],
                preferred_element_type=jnp.float32) + b2_ref[...]
    # Sigmoid = 1 / (1 + exp(-y)): exp and the approximate reciprocal both
    # issue on the EUP slot.
    o_ref[...] = pl.reciprocal(1.0 + jnp.exp(-y), approx=True)


# ----------------------------------------------------------------------------
# One-time parameter preparation (hoisted out of the per-forward path)
# ----------------------------------------------------------------------------
def prepare_ffn_params(w1, b1, w2, b2):
    """Pad the N dims to the 128-lane width and cast MXU operands to bf16.

    Call once at model load; the returned arrays are reused for every forward.
    w1: [H, FH], b1: [FH] or [1, FH], w2: [FH, O], b2: [O] or [1, O].
    """
    H, FH = w1.shape
    O = w2.shape[1]
    FHp = _round_up(FH, LANE)
    Op = _round_up(O, LANE)
    # Zero padding is neutral: padded b1/w1 columns give ReLU(0)=0 activations,
    # and the padded rows of w2 are zero as well.
    w1p = jnp.zeros((H, FHp), jnp.bfloat16).at[:, :FH].set(w1.astype(jnp.bfloat16))
    b1p = jnp.zeros((1, FHp), jnp.float32).at[:, :FH].set(
        b1.reshape(1, FH).astype(jnp.float32))
    w2p = jnp.zeros((FHp, Op), jnp.bfloat16).at[:FH, :O].set(w2.astype(jnp.bfloat16))
    b2p = jnp.zeros((1, Op), jnp.float32).at[:, :O].set(
        b2.reshape(1, O).astype(jnp.float32))
    return {"w1p": w1p, "b1p": b1p, "w2p": w2p, "b2p": b2p,
            "H": H, "FHp": FHp, "O": O, "Op": Op}


# ----------------------------------------------------------------------------
# Tiling / VMEM budgeting
# ----------------------------------------------------------------------------
def _vmem_bytes(tile_b, H, FHp, Op):
    return (2 * tile_b * H * 4        # x blocks, f32, double-buffered
            + 2 * tile_b * Op * 4     # output blocks, f32, double-buffered
            + H * FHp * 2 + FHp * 4   # W1 (bf16) + b1 (f32), single-buffered
            + FHp * Op * 2 + Op * 4   # W2 (bf16) + b2 (f32), single-buffered
            + tile_b * FHp * 4)       # live f32 intermediate activation


def _choose_tile_b(B, H, FHp, Op, *, max_tile_b=512, vmem_budget=48 << 20):
    max_tile_b = max(SUBLANE_BF16, _round_up(max_tile_b, SUBLANE_BF16))
    # Guarantee >=2 parallel grid steps when the batch is large enough so both
    # v7x TensorCores get work (harmless no-op on single-TC v5e/v6e).
    min_steps = 2 if B >= 2 * SUBLANE_BF16 else 1
    steps = max(min_steps, pl.cdiv(B, max_tile_b))
    tile_b = _round_up(pl.cdiv(B, steps), SUBLANE_BF16)
    # Shrink the batch tile until the working set fits the scoped-VMEM budget
    # (matters at chemprop scale, hidden ~ 2400; v5e default scoped is 16 MiB,
    #  v7x physical is 64 MiB).
    while tile_b > SUBLANE_BF16 and _vmem_bytes(tile_b, H, FHp, Op) > vmem_budget:
        tile_b = max(SUBLANE_BF16, _round_up(tile_b // 2, SUBLANE_BF16))
    return tile_b


# ----------------------------------------------------------------------------
# Forward (FFN head of MoleculeModel, classification, 2 ffn layers, eval mode)
# ----------------------------------------------------------------------------
def molecule_model_ffn(x, params, *, max_tile_b=512):
    """sigmoid(relu(x @ w1 + b1) @ w2 + b2) for x: [B, H] f32 -> [B, num_tasks] f32."""
    w1p, b1p, w2p, b2p = params["w1p"], params["b1p"], params["w2p"], params["b2p"]
    H, FHp, O, Op = params["H"], params["FHp"], params["O"], params["Op"]

    x = x.astype(jnp.float32)
    B = x.shape[0]
    assert x.shape[1] == H

    tile_b = _choose_tile_b(B, H, FHp, Op, max_tile_b=max_tile_b)
    Bp = _round_up(B, tile_b)           # waste bounded by ~16 rows per grid step
    grid = (Bp // tile_b,)

    # Only pad batch rows (and only when needed); feature dim stays unpadded
    # and f32 — the bf16 cast happens inside the kernel.
    if Bp != B:
        xp = jnp.zeros((Bp, H), jnp.float32).at[:B, :].set(x)
    else:
        xp = x

    vmem_limit = min(64 << 20,
                     max(32 << 20, int(1.25 * _vmem_bytes(tile_b, H, FHp, Op)) + (1 << 20)))

    def run(single_buffer_weights):
        if single_buffer_weights:
            # Constant-index blocks: single-buffer them (second buffer is dead).
            def const_spec(shape):
                return pl.BlockSpec(shape, lambda i: (0, 0),
                                    pipeline_mode=pl.Buffered(buffer_count=1))
        else:
            def const_spec(shape):
                return pl.BlockSpec(shape, lambda i: (0, 0))

        return pl.pallas_call(
            ffn_kernel,
            out_shape=jax.ShapeDtypeStruct((Bp, Op), jnp.float32),
            grid_spec=pltpu.PrefetchScalarGridSpec(
                num_scalar_prefetch=0,
                grid=grid,
                in_specs=[
                    pl.BlockSpec((tile_b, H), lambda i: (i, 0)),   # x rows over grid
                    const_spec((H, FHp)),                          # W1 (DMA'd once)
                    const_spec((1, FHp)),                          # b1
                    const_spec((FHp, Op)),                         # W2
                    const_spec((1, Op)),                           # b2
                ],
                out_specs=pl.BlockSpec((tile_b, Op), lambda i: (i, 0)),  # lane-dense
            ),
            compiler_params=pltpu.CompilerParams(
                dimension_semantics=("parallel",),
                vmem_limit_bytes=vmem_limit,
            ),
        )(xp, w1p, b1p, w2p, b2p)

    try:
        out_padded = run(single_buffer_weights=True)
    except Exception:
        # Fallback for jax versions where pipeline_mode/Buffered(1) is rejected.
        out_padded = run(single_buffer_weights=False)

    return out_padded[:B, :O]


# ----------------------------------------------------------------------------
# Test
# ----------------------------------------------------------------------------
def _linear_init(key, in_dim, out_dim):
    # torch.nn.Linear default: U(-1/sqrt(fan_in), 1/sqrt(fan_in))
    kw, kb = jax.random.split(key)
    bound = 1.0 / jnp.sqrt(jnp.array(in_dim, jnp.float32))
    w = jax.random.uniform(kw, (in_dim, out_dim), jnp.float32, -bound, bound)
    b = jax.random.uniform(kb, (1, out_dim), jnp.float32, -bound, bound)
    return w, b


if __name__ == "__main__":
    # Small config consistent with create_ffn:
    #   hidden_size = 32 (encoder output / first_linear_dim), ffn_hidden_size = 32,
    #   num_tasks = 4 (output_size), ffn_num_layers = 2, dataset_type='classification'.
    hidden_size = 32
    ffn_hidden_size = 32
    num_tasks = 4

    key = jax.random.PRNGKey(0)
    kx1, kx2, k1, k2 = jax.random.split(key, 4)

    w1, b1 = _linear_init(k1, hidden_size, ffn_hidden_size)
    w2, b2 = _linear_init(k2, ffn_hidden_size, num_tasks)
    params = prepare_ffn_params(w1, b1, w2, b2)   # one-time pad+cast (model load)

    def ref_fn(x):
        return jax.nn.sigmoid(jnp.maximum(x @ w1 + b1, 0.0) @ w2 + b2)

    # Case 1: tiny batch (single grid step).
    x_small = jax.random.normal(kx1, (16, hidden_size), jnp.float32)
    out_small = molecule_model_ffn(x_small, params)
    jax.block_until_ready(out_small)
    assert out_small.shape == (16, num_tasks)
    err_small = float(jnp.max(jnp.abs(out_small - ref_fn(x_small))))
    assert jnp.allclose(out_small, ref_fn(x_small), atol=2e-2, rtol=2e-2), err_small

    # Case 2: batch large enough to split into >=2 parallel grid steps
    # (both TensorCores busy on v7x).
    x_big = jax.random.normal(kx2, (64, hidden_size), jnp.float32)
    out_big = molecule_model_ffn(x_big, params)
    jax.block_until_ready(out_big)
    assert out_big.shape == (64, num_tasks)
    err_big = float(jnp.max(jnp.abs(out_big - ref_fn(x_big))))
    assert jnp.allclose(out_big, ref_fn(x_big), atol=2e-2, rtol=2e-2), err_big

    print("KERNEL_OK")
</pallas_src>

<mosaic_0001>
module attributes {stable_mosaic.version = 11 : i64} {
  func.func @ffn_kernel(%arg0: i32, %arg1: memref<16x32xf32, #tpu.memory_space<vmem>>, %arg2: memref<32x128xbf16, #tpu.memory_space<vmem>>, %arg3: memref<1x128xf32, #tpu.memory_space<vmem>>, %arg4: memref<128x128xbf16, #tpu.memory_space<vmem>>, %arg5: memref<1x128xf32, #tpu.memory_space<vmem>>, %arg6: memref<16x128xf32, #tpu.memory_space<vmem>>) attributes {dimension_semantics = [#tpu.dimension_semantics<parallel>], iteration_bounds = array<i64: 1>, scalar_prefetch = 0 : i64, scratch_operands = 0 : i64, tpu.core_type = #tpu.core_type<tc>, window_params = [{transform_indices = @transform_0, window_bounds = array<i64: 16, 32>}, {pipeline_mode = #tpu.pipeline_mode<synchronous>, transform_indices = @transform_1, window_bounds = array<i64: 32, 128>}, {pipeline_mode = #tpu.pipeline_mode<synchronous>, transform_indices = @transform_2, window_bounds = array<i64: 1, 128>}, {pipeline_mode = #tpu.pipeline_mode<synchronous>, transform_indices = @transform_3, window_bounds = array<i64: 128, 128>}, {pipeline_mode = #tpu.pipeline_mode<synchronous>, transform_indices = @transform_4, window_bounds = array<i64: 1, 128>}, {transform_indices = @transform_5, window_bounds = array<i64: 16, 128>}]} {
    %c0 = arith.constant 0 : index
    %c0_0 = arith.constant 0 : index
    %0 = vector.load %arg1[%c0, %c0_0] : memref<16x32xf32, #tpu.memory_space<vmem>>, vector<16x32xf32>
    %1 = arith.truncf %0 : vector<16x32xf32> to vector<16x32xbf16>
    %c0_1 = arith.constant 0 : index
    %c0_2 = arith.constant 0 : index
    %2 = vector.load %arg2[%c0_1, %c0_2] : memref<32x128xbf16, #tpu.memory_space<vmem>>, vector<32x128xbf16>
    %cst = arith.constant dense<0.000000e+00> : vector<16x128xf32>
    %3 = tpu.matmul %1, %2, %cst {dimension_numbers = #tpu.dot_dimension_numbers<[1], [0], [0], [1], [0, 0, 1, 1], [], []>} : vector<16x32xbf16>, vector<32x128xbf16>, vector<16x128xf32> -> vector<16x128xf32>
    %c0_3 = arith.constant 0 : index
    %c0_4 = arith.constant 0 : index
    %4 = vector.load %arg3[%c0_3, %c0_4] : memref<1x128xf32, #tpu.memory_space<vmem>>, vector<1x128xf32>
    %5 = vector.broadcast %4 : vector<1x128xf32> to vector<16x128xf32>
    %6 = arith.addf %3, %5 : vector<16x128xf32>
    %cst_5 = arith.constant 0.000000e+00 : f32
    %7 = vector.broadcast %cst_5 : f32 to vector<16x128xf32>
    %8 = arith.maximumf %6, %7 : vector<16x128xf32>
    %9 = arith.truncf %8 : vector<16x128xf32> to vector<16x128xbf16>
    %c0_6 = arith.constant 0 : index
    %c0_7 = arith.constant 0 : index
    %10 = vector.load %arg4[%c0_6, %c0_7] : memref<128x128xbf16, #tpu.memory_space<vmem>>, vector<128x128xbf16>
    %cst_8 = arith.constant dense<0.000000e+00> : vector<16x128xf32>
    %11 = tpu.matmul %9, %10, %cst_8 {dimension_numbers = #tpu.dot_dimension_numbers<[1], [0], [0], [1], [0, 0, 1, 1], [], []>} : vector<16x128xbf16>, vector<128x128xbf16>, vector<16x128xf32> -> vector<16x128xf32>
    %c0_9 = arith.constant 0 : index
    %c0_10 = arith.constant 0 : index
    %12 = vector.load %arg5[%c0_9, %c0_10] : memref<1x128xf32, #tpu.memory_space<vmem>>, vector<1x128xf32>
    %13 = vector.broadcast %12 : vector<1x128xf32> to vector<16x128xf32>
    %14 = arith.addf %11, %13 : vector<16x128xf32>
    %cst_11 = arith.constant 0.000000e+00 : f32
    %15 = vector.broadcast %cst_11 : f32 to vector<16x128xf32>
    %16 = arith.subf %15, %14 : vector<16x128xf32>
    %17 = math.exp %16 : vector<16x128xf32>
    %cst_12 = arith.constant 1.000000e+00 : f32
    %18 = vector.broadcast %cst_12 : f32 to vector<16x128xf32>
    %19 = arith.addf %18, %17 : vector<16x128xf32>
    %20 = tpu.reciprocal %19 {approx = true} : vector<16x128xf32> -> vector<16x128xf32>
    %c0_13 = arith.constant 0 : index
    %c0_14 = arith.constant 0 : index
    %21 = vector.load %arg6[%c0_13, %c0_14] : memref<16x128xf32, #tpu.memory_space<vmem>>, vector<16x128xf32>
    tpu.vector_store %arg6[%c0_13, %c0_14], %20 {strides = array<i32>} : memref<16x128xf32, #tpu.memory_space<vmem>>, vector<16x128xf32>,
    return
  }
  func.func @transform_0(%arg0: i32) -> (i32, i32) {
    %c0_i32 = arith.constant 0 : i32
    %c0_i32_0 = arith.constant 0 : i32
    return %arg0, %c0_i32 : i32, i32
  }
  func.func @transform_1(%arg0: i32) -> (i32, i32) {
    %c0_i32 = arith.constant 0 : i32
    %c0_i32_0 = arith.constant 0 : i32
    %c0_i32_1 = arith.constant 0 : i32
    return %c0_i32, %c0_i32_0 : i32, i32
  }
  func.func @transform_2(%arg0: i32) -> (i32, i32) {
    %c0_i32 = arith.constant 0 : i32
    %c0_i32_0 = arith.constant 0 : i32
    %c0_i32_1 = arith.constant 0 : i32
    return %c0_i32, %c0_i32_0 : i32, i32
  }
  func.func @transform_3(%arg0: i32) -> (i32, i32) {
    %c0_i32 = arith.constant 0 : i32
    %c0_i32_0 = arith.constant 0 : i32
    %c0_i32_1 = arith.constant 0 : i32
    return %c0_i32, %c0_i32_0 : i32, i32
  }
  func.func @transform_4(%arg0: i32) -> (i32, i32) {
    %c0_i32 = arith.constant 0 : i32
    %c0_i32_0 = arith.constant 0 : i32
    %c0_i32_1 = arith.constant 0 : i32
    return %c0_i32, %c0_i32_0 : i32, i32
  }
  func.func @transform_5(%arg0: i32) -> (i32, i32) {
    %c0_i32 = arith.constant 0 : i32
    %c0_i32_0 = arith.constant 0 : i32
    return %arg0, %c0_i32 : i32, i32
  }
}

module attributes {stable_mosaic.version = 11 : i64} {
  func.func @ffn_kernel(%arg0: i32, %arg1: memref<16x32xf32, #tpu.memory_space<vmem>>, %arg2: memref<32x128xbf16, #tpu.memory_space<vmem>>, %arg3: memref<1x128xf32, #tpu.memory_space<vmem>>, %arg4: memref<128x128xbf16, #tpu.memory_space<vmem>>, %arg5: memref<1x128xf32, #tpu.memory_space<vmem>>, %arg6: memref<16x128xf32, #tpu.memory_space<vmem>>) attributes {dimension_semantics = [#tpu.dimension_semantics<parallel>], iteration_bounds = array<i64: 1>, scalar_prefetch = 0 : i64, scratch_operands = 0 : i64, tpu.core_type = #tpu.core_type<tc>, window_params = [{transform_indices = @transform_0, window_bounds = array<i64: 16, 32>}, {pipeline_mode = #tpu.pipeline_mode<synchronous>, transform_indices = @transform_1, window_bounds = array<i64: 32, 128>}, {pipeline_mode = #tpu.pipeline_mode<synchronous>, transform_indices = @transform_2, window_bounds = array<i64: 1, 128>}, {pipeline_mode = #tpu.pipeline_mode<synchronous>, transform_indices = @transform_3, window_bounds = array<i64: 128, 128>}, {pipeline_mode = #tpu.pipeline_mode<synchronous>, transform_indices = @transform_4, window_bounds = array<i64: 1, 128>}, {transform_indices = @transform_5, window_bounds = array<i64: 16, 128>}]} {
    %c0 = arith.constant 0 : index
    %c0_0 = arith.constant 0 : index
    %0 = vector.load %arg1[%c0, %c0_0] : memref<16x32xf32, #tpu.memory_space<vmem>>, vector<16x32xf32>
    %1 = arith.truncf %0 : vector<16x32xf32> to vector<16x32xbf16>
    %c0_1 = arith.constant 0 : index
    %c0_2 = arith.constant 0 : index
    %2 = vector.load %arg2[%c0_1, %c0_2] : memref<32x128xbf16, #tpu.memory_space<vmem>>, vector<32x128xbf16>
    %cst = arith.constant dense<0.000000e+00> : vector<16x128xf32>
    %3 = tpu.matmul %1, %2, %cst {dimension_numbers = #tpu.dot_dimension_numbers<[1], [0], [0], [1], [0, 0, 1, 1], [], []>} : vector<16x32xbf16>, vector<32x128xbf16>, vector<16x128xf32> -> vector<16x128xf32>
    %c0_3 = arith.constant 0 : index
    %c0_4 = arith.constant 0 : index
    %4 = vector.load %arg3[%c0_3, %c0_4] : memref<1x128xf32, #tpu.memory_space<vmem>>, vector<1x128xf32>
    %5 = vector.broadcast %4 : vector<1x128xf32> to vector<16x128xf32>
    %6 = arith.addf %3, %5 : vector<16x128xf32>
    %cst_5 = arith.constant 0.000000e+00 : f32
    %7 = vector.broadcast %cst_5 : f32 to vector<16x128xf32>
    %8 = arith.maximumf %6, %7 : vector<16x128xf32>
    %9 = arith.truncf %8 : vector<16x128xf32> to vector<16x128xbf16>
    %c0_6 = arith.constant 0 : index
    %c0_7 = arith.constant 0 : index
    %10 = vector.load %arg4[%c0_6, %c0_7] : memref<128x128xbf16, #tpu.memory_space<vmem>>, vector<128x128xbf16>
    %cst_8 = arith.constant dense<0.000000e+00> : vector<16x128xf32>
    %11 = tpu.matmul %9, %10, %cst_8 {dimension_numbers = #tpu.dot_dimension_numbers<[1], [0], [0], [1], [0, 0, 1, 1], [], []>} : vector<16x128xbf16>, vector<128x128xbf16>, vector<16x128xf32> -> vector<16x128xf32>
    %c0_9 = arith.constant 0 : index
    %c0_10 = arith.constant 0 : index
    %12 = vector.load %arg5[%c0_9, %c0_10] : memref<1x128xf32, #tpu.memory_space<vmem>>, vector<1x128xf32>
    %13 = vector.broadcast %12 : vector<1x128xf32> to vector<16x128xf32>
    %14 = arith.addf %11, %13 : vector<16x128xf32>
    %cst_11 = arith.constant 0.000000e+00 : f32
    %15 = vector.broadcast %cst_11 : f32 to vector<16x128xf32>
    %16 = arith.subf %15, %14 : vector<16x128xf32>
    %17 = math.exp %16 : vector<16x128xf32>
    %cst_12 = arith.constant 1.000000e+00 : f32
    %18 = vector.broadcast %cst_12 : f32 to vector<16x128xf32>
    %19 = arith.addf %18, %17 : vector<16x128xf32>
    %20 = tpu.reciprocal %19 {approx = true} : vector<16x128xf32> -> vector<16x128xf32>
    %c0_13 = arith.constant 0 : index
    %c0_14 = arith.constant 0 : index
    %21 = vector.load %arg6[%c0_13, %c0_14] : memref<16x128xf32, #tpu.memory_space<vmem>>, vector<16x128xf32>
    tpu.vector_store %arg6[%c0_13, %c0_14], %20 {strides = array<i32>} : memref<16x128xf32, #tpu.memory_space<vmem>>, vector<16x128xf32>,
    return
  }
  func.func @transform_0(%arg0: i32) -> (i32, i32) {
    %c0_i32 = arith.constant 0 : i32
    %c0_i32_0 = arith.constant 0 : i32
    return %arg0, %c0_i32 : i32, i32
  }
  func.func @transform_1(%arg0: i32) -> (i32, i32) {
    %c0_i32 = arith.constant 0 : i32
    %c0_i32_0 = arith.constant 0 : i32
    %c0_i32_1 = arith.constant 0 : i32
    return %c0_i32, %c0_i32_0 : i32, i32
  }
  func.func @transform_2(%arg0: i32) -> (i32, i32) {
    %c0_i32 = arith.constant 0 : i32
    %c0_i32_0 = arith.constant 0 : i32
    %c0_i32_1 = arith.constant 0 : i32
    return %c0_i32, %c0_i32_0 : i32, i32
  }
  func.func @transform_3(%arg0: i32) -> (i32, i32) {
    %c0_i32 = arith.constant 0 : i32
    %c0_i32_0 = arith.constant 0 : i32
    %c0_i32_1 = arith.constant 0 : i32
    return %c0_i32, %c0_i32_0 : i32, i32
  }
  func.func @transform_4(%arg0: i32) -> (i32, i32) {
    %c0_i32 = arith.constant 0 : i32
    %c0_i32_0 = arith.constant 0 : i32
    %c0_i32_1 = arith.constant 0 : i32
    return %c0_i32, %c0_i32_0 : i32, i32
  }
  func.func @transform_5(%arg0: i32) -> (i32, i32) {
    %c0_i32 = arith.constant 0 : i32
    %c0_i32_0 = arith.constant 0 : i32
    return %arg0, %c0_i32 : i32, i32
  }
}

</mosaic_0001>

<bundles_post_ra>
// kernel: tpu_custom_call.1
= control target key start
LH: loop header
LB: loop body
LE: loop exit
PB: predicated region body
PF: predicated region fallthrough
CT: control target
= control target key end

     0   :  { %10 = vsyncpa [#allocation3], 0  ;;  %s560_s0 = inlined_call_operand.hbm [shape: f32[16,32], index: 0, kind: input, shape index: {}]   ;;  %s561_s1 = inlined_call_operand.hbm [shape: bf16[32,128], index: 1, kind: input, shape index: {}]   ;;  %s562_s2 = inlined_call_operand.vmem [shape: f32[1,128], index: 2, kind: input, shape index: {}]   ;;  %s563_s3 = inlined_call_operand.hbm [shape: bf16[128,128], index: 3, kind: input, shape index: {}]   ;;  %s564_s4 = inlined_call_operand.vmem [shape: f32[1,128], index: 4, kind: input, shape index: {}]   ;;  %s565_s5 = inlined_call_operand.hbm [shape: f32[16,128], index: 5, kind: output, shape index: {}]  }
   0x1   :  { %11 = vsyncpa [#allocation6], 0 }
   0x2   :  { %12 = vsyncpa [#allocation4], 0  ;;  %s454_s18 = smov [#allocation5]   ;;  %s360_s22 = scalar_lea.hbm %s561_s1, 256 }
   0x3   :  { %s30_s19 = sshll.u32 %s454_s18, 4  ;;  %p361_p0 = scmp.ne.s32.totalorder %s561_s1, %s360_s22  ;;  %s31_s19 = int_to_ptr.vmem [resolvable:$true] %s30_s19 }
   0x4   :  { %p364_p1 = scmp.lt.u32.totalorder %s360_s22, %s561_s1 }
   0x6   :  { %p366_p2 = pnand %p364_p1, %p361_p0 }
   0x8   :  { %369 = shalt.err (!%p366_p2)
}
   0x9   :  { %s370_s27 = scalar_lea.vmem %s31_s19, 256  ;;  %p375_p4 = scmp.lt.s32.totalorder %s31_s19, %s31_s19 }
   0xa   :  { %p371_p3 = scmp.ne.s32.totalorder %s31_s19, %s370_s27  ;;  %p376_p5 = scmp.lt.s32.totalorder %s370_s27, %s370_s27 }
   0xc   :  { %p377_p6 = por %p376_p5, %p375_p4 }
   0xe   :  { %p378_p7 = pnand %p377_p6, %p371_p3 }
  0x10   :  { %381 = shalt.err (!%p378_p7)
}
  0x11   :  { %s455_s28 = smov 64   ;;  %s456_s29 = smov 4  }
  0x12   :  { %36 = dma.hbm_to_vmem [thread:$0]  %s561_s1, 256, %s31_s19, [#allocation6], %s455_s28, %s455_s28, %s456_s29  }
  0x13   :  { %s457_s7 = smov [#allocation2]   ;;  %s382_s11 = scalar_lea.hbm %s560_s0, 256 }
  0x14   :  { %s18_s8 = sshll.u32 %s457_s7, 4  ;;  %p383_p8 = scmp.ne.s32.totalorder %s560_s0, %s382_s11  ;;  %s19_s8 = int_to_ptr.vmem [resolvable:$true] %s18_s8 }
  0x15   :  { %p386_p9 = scmp.lt.u32.totalorder %s382_s11, %s560_s0 }
  0x17   :  { %p388_p10 = pnand %p386_p9, %p383_p8 }
  0x19   :  { %391 = shalt.err (!%p388_p10)
}
  0x1a   :  { %s392_s16 = scalar_lea.vmem %s19_s8, 256  ;;  %p397_p12 = scmp.lt.s32.totalorder %s19_s8, %s19_s8 }
  0x1b   :  { %p393_p11 = scmp.ne.s32.totalorder %s19_s8, %s392_s16  ;;  %p398_p13 = scmp.lt.s32.totalorder %s392_s16, %s392_s16 }
  0x1d   :  { %p399_p0 = por %p398_p13, %p397_p12 }
  0x1f   :  { %p400_p1 = pnand %p399_p0, %p393_p11 }
  0x21   :  { %403 = shalt.err (!%p400_p1)
}
  0x22   :  { %s458_s1 = smov 128   ;;  %s459_s17 = smov 8  }
  0x23   :  { %24 = dma.hbm_to_vmem [thread:$0]  %s560_s0, 256, %s19_s8, [#allocation3], %s458_s1, %s458_s1, %s459_s17  }
  0x24   :  { %s460_s20 = smov [#allocation7]   ;;  %s404_s24 = scalar_lea.hbm %s563_s3, 1024 }
  0x25   :  { %s44_s21 = sshll.u32 %s460_s20, 4  ;;  %p405_p2 = scmp.ne.s32.totalorder %s563_s3, %s404_s24  ;;  %s45_s21 = int_to_ptr.vmem [resolvable:$true] %s44_s21 }
  0x26   :  { %p408_p3 = scmp.lt.u32.totalorder %s404_s24, %s563_s3 }
  0x28   :  { %p410_p4 = pnand %p408_p3, %p405_p2 }
  0x2a   :  { %413 = shalt.err (!%p410_p4)
}
  0x2b   :  { %s414_s6 = scalar_lea.vmem %s45_s21, 1024  ;;  %p419_p6 = scmp.lt.s32.totalorder %s45_s21, %s45_s21 }
  0x2c   :  { %p415_p5 = scmp.ne.s32.totalorder %s45_s21, %s414_s6  ;;  %p420_p7 = scmp.lt.s32.totalorder %s414_s6, %s414_s6 }
  0x2e   :  { %p421_p8 = por %p420_p7, %p419_p6 }
  0x30   :  { %p422_p9 = pnand %p421_p8, %p415_p5 }
  0x32   :  { %425 = shalt.err (!%p422_p9)
}
  0x33   :  { %50 = dma.hbm_to_vmem [thread:$0]  %s563_s3, 1024, %s45_s21, [#allocation6], %s455_s28, %s455_s28, %s456_s29  }
  0x34   :  { %448 = dma.done.wait [#allocation3], 256  }
  0x35   :  { %449 = vsyncadd [#allocation3], 4294967040 }
  0x36   :  { %450 = dma.done.wait [#allocation6], 1280  }
  0x37   :  { %451 = vsyncadd [#allocation6], 4294966016  ;;  %v461_v0 = vmov 0.0   ;;  %vm462_vm0 = vmmov 0   ;;  %v342_v1 = vld [vmem:[#allocation5] sm:$0xff]   ;;  %v343_v2 = vld [vmem:[#allocation5 + $0x8] sm:$0xff]  }
  0x38   :  { %304 = vmatprep.subr.bf16.mxu0 %v461_v0  ;;  %308 = vmatprep.mubr.msk.bf16.mxu0 %vm462_vm0, %v461_v0  ;;  %v63_v3 = vld [vmem:[#allocation2] sm:$0xff]  ;;  %v64_v4 = vld [vmem:[#allocation2 + $0x8] sm:$0xff]  ;;  %vm89_vm1 = vcmask 261120   ;;  %v346_v8 = vld [vmem:[#allocation7 + $0x10] sm:$0xff]  }
  0x39   :  { %312 = vmatprep.subr.bf16.mxu1 %v461_v0  ;;  %328 = vmatprep.mubr.msk.bf16.mxu1 %vm462_vm0, %v461_v0  ;;  %v344_v5 = vld [vmem:[#allocation7] sm:$0xff]   ;;  %v65_v6 = vpack.c.bf16 %v64_v4, %v63_v3  ;;  %v345_v7 = vld [vmem:[#allocation7 + $0x8] sm:$0xff]   ;;  %v347_v9 = vld [vmem:[#allocation7 + $0x18] sm:$0xff]  }
  0x3a   :  { %305 = vmatpush3.bf16.msra.mxu0 %v342_v1  ;;  %313 = vmatpush3.bf16.msra.mxu1 %v344_v5  ;;  %v348_v10 = vld [vmem:[#allocation7 + $0x20] sm:$0xff]   ;;  %v349_v11 = vld [vmem:[#allocation7 + $0x28] sm:$0xff]   ;;  %v350_v12 = vld [vmem:[#allocation7 + $0x30] sm:$0xff]  }
  0x3b   :  { %306 = vmatprep.subr.bf16.mxu0 %v461_v0  ;;  %314 = vmatprep.subr.bf16.mxu1 %v461_v0  ;;  %v351_v13 = vld [vmem:[#allocation7 + $0x38] sm:$0xff]   ;;  %v279_v14 = vld [vmem:[%s562_s2] ss:$0 sm:$0xff]  ;;  %s463_s2 = smov [#allocation8]  }
  0x3c   :  { %v283_v24 = vld [vmem:[%s564_s4] ss:$0 sm:$0xff]  ;;  %s266_s4 = sshll.u32 %s463_s2, 4  ;;  %s267_s4 = int_to_ptr.vmem [resolvable:$true] %s266_s4 }
  0x3d   :  { %s426_s9 = scalar_lea.vmem %s267_s4, 256  ;;  %p431_p11 = scmp.lt.s32.totalorder %s267_s4, %s267_s4 }
  0x3e   :  { %307 = vmatpush3.bf16.msra.mxu0 %v343_v2  ;;  %315 = vmatpush3.bf16.msra.mxu1 %v345_v7  ;;  %p427_p10 = scmp.ne.s32.totalorder %s267_s4, %s426_s9  ;;  %p432_p12 = scmp.lt.s32.totalorder %s426_s9, %s426_s9 }
  0x3f   :  { %316 = vmatprep.subr.bf16.mxu1 %v461_v0 }
  0x40   :  { %p433_p13 = por %p432_p12, %p431_p11 }
  0x41   :  { %309 = vmatmul.mubr.msk.bf16.vlgmr.msra.gmra.mrb[0].mxu0 %vm89_vm1, %v65_v6 }
  0x42   :  { %317 = vmatpush3.bf16.msra.mxu1 %v346_v8  ;;  %p434_p0 = pnand %p433_p13, %p427_p10 }
  0x43   :  { %318 = vmatprep.subr.bf16.mxu1 %v461_v0 }
  0x46   :  { %319 = vmatpush3.bf16.msra.mxu1 %v347_v9 }
  0x47   :  { %320 = vmatprep.subr.bf16.mxu1 %v461_v0 }
  0x4a   :  { %321 = vmatpush3.bf16.msra.mxu1 %v348_v10 }
  0x4b   :  { %322 = vmatprep.subr.bf16.mxu1 %v461_v0 }
  0x4e   :  { %323 = vmatpush3.bf16.msra.mxu1 %v349_v11 }
  0x4f   :  { %324 = vmatprep.subr.bf16.mxu1 %v461_v0 }
  0x52   :  { %325 = vmatpush3.bf16.msra.mxu1 %v350_v12 }
  0x53   :  { %326 = vmatprep.subr.bf16.mxu1 %v461_v0 }
  0x56   :  { %327 = vmatpush3.bf16.msra.mxu1 %v351_v13 }
 0x114   :  { %v127_v15 = vpop.f32.mrb[0].mxu0 }
 0x115   :  { %v128_v16 = vadd.f32 %v279_v14, %v127_v15  ;;  %v310_v17 = vpop.f32.mrb[1].mxu0 }
 0x116   :  { %v130_v18 = vpop.f32.mrb[2].mxu0 }
 0x117   :  { %v131_v19 = vadd.f32 %v279_v14, %v130_v18  ;;  %v311_v20 = vpop.f32.mrb[3].mxu0  ;;  %v134_v21 = vmax.f32 %v128_v16, 0.0 }
 0x119   :  { %v135_v22 = vmax.f32 %v131_v19, 0.0 }
 0x11b   :  { %v136_v23 = vpack.c.bf16 %v135_v22, %v134_v21 }
 0x11d   :  { %329 = vmatmul.mubr.bf16.vlgmr.msra.gmra.mrb[0].mxu1 %v136_v23 }
 0x1f0   :  { %v242_v25 = vpop.f32.mrb[0].mxu1 }
 0x1f1   :  { %v243_v26 = vadd.f32 %v283_v24, %v242_v25  ;;  %v330_v27 = vpop.f32.mrb[1].mxu1 }
 0x1f2   :  { %v245_v28 = vpop.f32.mrb[2].mxu1 }
 0x1f3   :  { %v249_v29 = vsub.f32 0.0, %v243_v26  ;;  %v246_v30 = vadd.f32 %v283_v24, %v245_v28  ;;  %v331_v31 = vpop.f32.mrb[3].mxu1 }
 0x1f5   :  { %v251_v32 = vmul.f32 1.442695, %v249_v29  ;;  %v250_v33 = vsub.f32 0.0, %v246_v30 }
 0x1f7   :  { %352 = vpow2.f32 %v251_v32  ;;  %v253_v34 = vmul.f32 1.442695, %v250_v33 }
 0x1f9   :  { %354 = vpow2.f32 %v253_v34 }
 0x201   :  { %v353_v35 = vpop.eup %352 }
 0x202   :  { %v255_v36 = vadd.f32 1.0, %v353_v35 }
 0x203   :  { %v355_v37 = vpop.eup %354 }
 0x204   :  { %356 = vrcp.f32 %v255_v36  ;;  %v256_v38 = vadd.f32 1.0, %v355_v37 }
 0x206   :  { %358 = vrcp.f32 %v256_v38 }
 0x20e   :  { %v357_v39 = vpop.eup %356 }
 0x20f   :  { %259 = vst [vmem:[#allocation8] sm:$0xff] %v357_v39 }
 0x210   :  { %v359_v40 = vpop.eup %358 }
 0x211   :  { %260 = vst [vmem:[#allocation8 + $0x8] sm:$0xff] %v359_v40 }
 0x212   :  { %437 = shalt.err (!%p434_p0)
}
 0x213   :  { %s438_s12 = scalar_lea.hbm %s565_s5, 256 }
 0x214   :  { %p439_p1 = scmp.ne.s32.totalorder %s565_s5, %s438_s12  ;;  %p442_p2 = scmp.lt.u32.totalorder %s438_s12, %s565_s5 }
 0x216   :  { %p444_p3 = pnand %p442_p2, %p439_p1 }
 0x218   :  { %447 = shalt.err (!%p444_p3)
}
 0x219   :  { %272 = dma.vmem_to_hbm [thread:$0]  %s267_s4, 256, %s565_s5, [#allocation4], %s458_s1, %s458_s1, %s459_s17  }
 0x21a   :  { %452 = dma.done.wait [#allocation4], 256  }
 0x21b   :  { %453 = vsyncadd [#allocation4], 4294967040 }
 0x21c   :  { %276 = vsyncpa [#allocation3], 1 }
 0x21d   :  { %277 = vsyncpa [#allocation6], 1 }
 0x21e   :  { %278 = vsyncpa [#allocation4], 1 }

// kernel: tpu_custom_call.1
= control target key start
LH: loop header
LB: loop body
LE: loop exit
PB: predicated region body
PF: predicated region fallthrough
CT: control target
= control target key end

     0   :  { %10 = vsyncpa [#allocation3], 0  ;;  %s560_s0 = inlined_call_operand.hbm [shape: f32[16,32], index: 0, kind: input, shape index: {}]   ;;  %s561_s1 = inlined_call_operand.hbm [shape: bf16[32,128], index: 1, kind: input, shape index: {}]   ;;  %s562_s2 = inlined_call_operand.vmem [shape: f32[1,128], index: 2, kind: input, shape index: {}]   ;;  %s563_s3 = inlined_call_operand.hbm [shape: bf16[128,128], index: 3, kind: input, shape index: {}]   ;;  %s564_s4 = inlined_call_operand.vmem [shape: f32[1,128], index: 4, kind: input, shape index: {}]   ;;  %s565_s5 = inlined_call_operand.hbm [shape: f32[16,128], index: 5, kind: output, shape index: {}]  }
   0x1   :  { %11 = vsyncpa [#allocation6], 0 }
   0x2   :  { %12 = vsyncpa [#allocation4], 0  ;;  %s454_s18 = smov [#allocation5]   ;;  %s360_s22 = scalar_lea.hbm %s561_s1, 256 }
   0x3   :  { %s30_s19 = sshll.u32 %s454_s18, 4  ;;  %p361_p0 = scmp.ne.s32.totalorder %s561_s1, %s360_s22  ;;  %s31_s19 = int_to_ptr.vmem [resolvable:$true] %s30_s19 }
   0x4   :  { %p364_p1 = scmp.lt.u32.totalorder %s360_s22, %s561_s1 }
   0x6   :  { %p366_p2 = pnand %p364_p1, %p361_p0 }
   0x8   :  { %369 = shalt.err (!%p366_p2)
}
   0x9   :  { %s370_s27 = scalar_lea.vmem %s31_s19, 256  ;;  %p375_p4 = scmp.lt.s32.totalorder %s31_s19, %s31_s19 }
   0xa   :  { %p371_p3 = scmp.ne.s32.totalorder %s31_s19, %s370_s27  ;;  %p376_p5 = scmp.lt.s32.totalorder %s370_s27, %s370_s27 }
   0xc   :  { %p377_p6 = por %p376_p5, %p375_p4 }
   0xe   :  { %p378_p7 = pnand %p377_p6, %p371_p3 }
  0x10   :  { %381 = shalt.err (!%p378_p7)
}
  0x11   :  { %s455_s28 = smov 64   ;;  %s456_s29 = smov 4  }
  0x12   :  { %36 = dma.hbm_to_vmem [thread:$0]  %s561_s1, 256, %s31_s19, [#allocation6], %s455_s28, %s455_s28, %s456_s29  }
  0x13   :  { %s457_s7 = smov [#allocation2]   ;;  %s382_s11 = scalar_lea.hbm %s560_s0, 256 }
  0x14   :  { %s18_s8 = sshll.u32 %s457_s7, 4  ;;  %p383_p8 = scmp.ne.s32.totalorder %s560_s0, %s382_s11  ;;  %s19_s8 = int_to_ptr.vmem [resolvable:$true] %s18_s8 }
  0x15   :  { %p386_p9 = scmp.lt.u32.totalorder %s382_s11, %s560_s0 }
  0x17   :  { %p388_p10 = pnand %p386_p9, %p383_p8 }
  0x19   :  { %391 = shalt.err (!%p388_p10)
}
  0x1a   :  { %s392_s16 = scalar_lea.vmem %s19_s8, 256  ;;  %p397_p12 = scmp.lt.s32.totalorder %s19_s8, %s19_s8 }
  0x1b   :  { %p393_p11 = scmp.ne.s32.totalorder %s19_s8, %s392_s16  ;;  %p398_p13 = scmp.lt.s32.totalorder %s392_s16, %s392_s16 }
  0x1d   :  { %p399_p0 = por %p398_p13, %p397_p12 }
  0x1f   :  { %p400_p1 = pnand %p399_p0, %p393_p11 }
  0x21   :  { %403 = shalt.err (!%p400_p1)
}
  0x22   :  { %s458_s1 = smov 128   ;;  %s459_s17 = smov 8  }
  0x23   :  { %24 = dma.hbm_to_vmem [thread:$0]  %s560_s0, 256, %s19_s8, [#allocation3], %s458_s1, %s458_s1, %s459_s17  }
  0x24   :  { %s460_s20 = smov [#allocation7]   ;;  %s404_s24 = scalar_lea.hbm %s563_s3, 1024 }
  0x25   :  { %s44_s21 = sshll.u32 %s460_s20, 4  ;;  %p405_p2 = scmp.ne.s32.totalorder %s563_s3, %s404_s24  ;;  %s45_s21 = int_to_ptr.vmem [resolvable:$true] %s44_s21 }
  0x26   :  { %p408_p3 = scmp.lt.u32.totalorder %s404_s24, %s563_s3 }
  0x28   :  { %p410_p4 = pnand %p408_p3, %p405_p2 }
  0x2a   :  { %413 = shalt.err (!%p410_p4)
}
  0x2b   :  { %s414_s6 = scalar_lea.vmem %s45_s21, 1024  ;;  %p419_p6 = scmp.lt.s32.totalorder %s45_s21, %s45_s21 }
  0x2c   :  { %p415_p5 = scmp.ne.s32.totalorder %s45_s21, %s414_s6  ;;  %p420_p7 = scmp.lt.s32.totalorder %s414_s6, %s414_s6 }
  0x2e   :  { %p421_p8 = por %p420_p7, %p419_p6 }
  0x30   :  { %p422_p9 = pnand %p421_p8, %p415_p5 }
  0x32   :  { %425 = shalt.err (!%p422_p9)
}
  0x33   :  { %50 = dma.hbm_to_vmem [thread:$0]  %s563_s3, 1024, %s45_s21, [#allocation6], %s455_s28, %s455_s28, %s456_s29  }
  0x34   :  { %448 = dma.done.wait [#allocation3], 256  }
  0x35   :  { %449 = vsyncadd [#allocation3], 4294967040 }
  0x36   :  { %450 = dma.done.wait [#allocation6], 1280  }
  0x37   :  { %451 = vsyncadd [#allocation6], 4294966016  ;;  %v461_v0 = vmov 0.0   ;;  %vm462_vm0 = vmmov 0   ;;  %v342_v1 = vld [vmem:[#allocation5] sm:$0xff]   ;;  %v343_v2 = vld [vmem:[#allocation5 + $0x8] sm:$0xff]  }
  0x38   :  { %304 = vmatprep.subr.bf16.mxu0 %v461_v0  ;;  %308 = vmatprep.mubr.msk.bf16.mxu0 %vm462_vm0, %v461_v0  ;;  %v63_v3 = vld [vmem:[#allocation2] sm:$0xff]  ;;  %v64_v4 = vld [vmem:[#allocation2 + $0x8] sm:$0xff]  ;;  %vm89_vm1 = vcmask 261120   ;;  %v346_v8 = vld [vmem:[#allocation7 + $0x10] sm:$0xff]  }
  0x39   :  { %312 = vmatprep.subr.bf16.mxu1 %v461_v0  ;;  %328 = vmatprep.mubr.msk.bf16.mxu1 %vm462_vm0, %v461_v0  ;;  %v344_v5 = vld [vmem:[#allocation7] sm:$0xff]   ;;  %v65_v6 = vpack.c.bf16 %v64_v4, %v63_v3  ;;  %v345_v7 = vld [vmem:[#allocation7 + $0x8] sm:$0xff]   ;;  %v347_v9 = vld [vmem:[#allocation7 + $0x18] sm:$0xff]  }
  0x3a   :  { %305 = vmatpush3.bf16.msra.mxu0 %v342_v1  ;;  %313 = vmatpush3.bf16.msra.mxu1 %v344_v5  ;;  %v348_v10 = vld [vmem:[#allocation7 + $0x20] sm:$0xff]   ;;  %v349_v11 = vld [vmem:[#allocation7 + $0x28] sm:$0xff]   ;;  %v350_v12 = vld [vmem:[#allocation7 + $0x30] sm:$0xff]  }
  0x3b   :  { %306 = vmatprep.subr.bf16.mxu0 %v461_v0  ;;  %314 = vmatprep.subr.bf16.mxu1 %v461_v0  ;;  %v351_v13 = vld [vmem:[#allocation7 + $0x38] sm:$0xff]   ;;  %v279_v14 = vld [vmem:[%s562_s2] ss:$0 sm:$0xff]  ;;  %s463_s2 = smov [#allocation8]  }
  0x3c   :  { %v283_v24 = vld [vmem:[%s564_s4] ss:$0 sm:$0xff]  ;;  %s266_s4 = sshll.u32 %s463_s2, 4  ;;  %s267_s4 = int_to_ptr.vmem [resolvable:$true] %s266_s4 }
  0x3d   :  { %s426_s9 = scalar_lea.vmem %s267_s4, 256  ;;  %p431_p11 = scmp.lt.s32.totalorder %s267_s4, %s267_s4 }
  0x3e   :  { %307 = vmatpush3.bf16.msra.mxu0 %v343_v2  ;;  %315 = vmatpush3.bf16.msra.mxu1 %v345_v7  ;;  %p427_p10 = scmp.ne.s32.totalorder %s267_s4, %s426_s9  ;;  %p432_p12 = scmp.lt.s32.totalorder %s426_s9, %s426_s9 }
  0x3f   :  { %316 = vmatprep.subr.bf16.mxu1 %v461_v0 }
  0x40   :  { %p433_p13 = por %p432_p12, %p431_p11 }
  0x41   :  { %309 = vmatmul.mubr.msk.bf16.vlgmr.msra.gmra.mrb[0].mxu0 %vm89_vm1, %v65_v6 }
  0x42   :  { %317 = vmatpush3.bf16.msra.mxu1 %v346_v8  ;;  %p434_p0 = pnand %p433_p13, %p427_p10 }
  0x43   :  { %318 = vmatprep.subr.bf16.mxu1 %v461_v0 }
  0x46   :  { %319 = vmatpush3.bf16.msra.mxu1 %v347_v9 }
  0x47   :  { %320 = vmatprep.subr.bf16.mxu1 %v461_v0 }
  0x4a   :  { %321 = vmatpush3.bf16.msra.mxu1 %v348_v10 }
  0x4b   :  { %322 = vmatprep.subr.bf16.mxu1 %v461_v0 }
  0x4e   :  { %323 = vmatpush3.bf16.msra.mxu1 %v349_v11 }
  0x4f   :  { %324 = vmatprep.subr.bf16.mxu1 %v461_v0 }
  0x52   :  { %325 = vmatpush3.bf16.msra.mxu1 %v350_v12 }
  0x53   :  { %326 = vmatprep.subr.bf16.mxu1 %v461_v0 }
  0x56   :  { %327 = vmatpush3.bf16.msra.mxu1 %v351_v13 }
 0x114   :  { %v127_v15 = vpop.f32.mrb[0].mxu0 }
 0x115   :  { %v128_v16 = vadd.f32 %v279_v14, %v127_v15  ;;  %v310_v17 = vpop.f32.mrb[1].mxu0 }
 0x116   :  { %v130_v18 = vpop.f32.mrb[2].mxu0 }
 0x117   :  { %v131_v19 = vadd.f32 %v279_v14, %v130_v18  ;;  %v311_v20 = vpop.f32.mrb[3].mxu0  ;;  %v134_v21 = vmax.f32 %v128_v16, 0.0 }
 0x119   :  { %v135_v22 = vmax.f32 %v131_v19, 0.0 }
 0x11b   :  { %v136_v23 = vpack.c.bf16 %v135_v22, %v134_v21 }
 0x11d   :  { %329 = vmatmul.mubr.bf16.vlgmr.msra.gmra.mrb[0].mxu1 %v136_v23 }
 0x1f0   :  { %v242_v25 = vpop.f32.mrb[0].mxu1 }
 0x1f1   :  { %v243_v26 = vadd.f32 %v283_v24, %v242_v25  ;;  %v330_v27 = vpop.f32.mrb[1].mxu1 }
 0x1f2   :  { %v245_v28 = vpop.f32.mrb[2].mxu1 }
 0x1f3   :  { %v249_v29 = vsub.f32 0.0, %v243_v26  ;;  %v246_v30 = vadd.f32 %v283_v24, %v245_v28  ;;  %v331_v31 = vpop.f32.mrb[3].mxu1 }
 0x1f5   :  { %v251_v32 = vmul.f32 1.442695, %v249_v29  ;;  %v250_v33 = vsub.f32 0.0, %v246_v30 }
 0x1f7   :  { %352 = vpow2.f32 %v251_v32  ;;  %v253_v34 = vmul.f32 1.442695, %v250_v33 }
 0x1f9   :  { %354 = vpow2.f32 %v253_v34 }
 0x201   :  { %v353_v35 = vpop.eup %352 }
 0x202   :  { %v255_v36 = vadd.f32 1.0, %v353_v35 }
 0x203   :  { %v355_v37 = vpop.eup %354 }
 0x204   :  { %356 = vrcp.f32 %v255_v36  ;;  %v256_v38 = vadd.f32 1.0, %v355_v37 }
 0x206   :  { %358 = vrcp.f32 %v256_v38 }
 0x20e   :  { %v357_v39 = vpop.eup %356 }
 0x20f   :  { %259 = vst [vmem:[#allocation8] sm:$0xff] %v357_v39 }
 0x210   :  { %v359_v40 = vpop.eup %358 }
 0x211   :  { %260 = vst [vmem:[#allocation8 + $0x8] sm:$0xff] %v359_v40 }
 0x212   :  { %437 = shalt.err (!%p434_p0)
}
 0x213   :  { %s438_s12 = scalar_lea.hbm %s565_s5, 256 }
 0x214   :  { %p439_p1 = scmp.ne.s32.totalorder %s565_s5, %s438_s12  ;;  %p442_p2 = scmp.lt.u32.totalorder %s438_s12, %s565_s5 }
 0x216   :  { %p444_p3 = pnand %p442_p2, %p439_p1 }
 0x218   :  { %447 = shalt.err (!%p444_p3)
}
 0x219   :  { %272 = dma.vmem_to_hbm [thread:$0]  %s267_s4, 256, %s565_s5, [#allocation4], %s458_s1, %s458_s1, %s459_s17  }
 0x21a   :  { %452 = dma.done.wait [#allocation4], 256  }
 0x21b   :  { %453 = vsyncadd [#allocation4], 4294967040 }
 0x21c   :  { %276 = vsyncpa [#allocation3], 1 }
 0x21d   :  { %277 = vsyncpa [#allocation6], 1 }
 0x21e   :  { %278 = vsyncpa [#allocation4], 1 }

</bundles_post_ra>
